<compile_context>
chip_gen: v6e
topology: v6e:2x2x1
jax: 0.10.0
libtpu: 0.0.40
codegen_flags: <defaults>
</compile_context>

<pallas_src>
import math
from functools import partial

import jax
import jax.numpy as jnp
from jax.experimental import pallas as pl
from jax.experimental.pallas import tpu as pltpu


def _round_up(x: int, m: int) -> int:
    return (x + m - 1) // m * m


# ----------------------------- Pallas kernel ------------------------------ #
def classifier_kernel(x_ref, wfe_ref, w1_ref, b1_ref, w2_ref, b2_ref,
                      w3_ref, b3_ref, o_ref):
    bf = jnp.bfloat16
    # x is streamed f32 from HBM; cast to bf16 in-register for the MXU.
    x_bf = x_ref[...].astype(bf)
    # Fused frozen feature-extractor projection: (tb, K) @ (K, Fp), f32 accum.
    feats = jnp.dot(x_bf, wfe_ref[...], preferred_element_type=jnp.float32)
    # fc1 + ReLU (bf16 MXU operands, f32 accumulate, f32 VPU elementwise)
    h1 = jnp.dot(feats.astype(bf), w1_ref[...], preferred_element_type=jnp.float32)
    h1 = jnp.maximum(h1 + b1_ref[...], 0.0)
    # fc2 + ReLU
    h2 = jnp.dot(h1.astype(bf), w2_ref[...], preferred_element_type=jnp.float32)
    h2 = jnp.maximum(h2 + b2_ref[...], 0.0)
    # fc3 + sigmoid (exp on the EUP); lane-dense (tb, 128) bf16 store.
    logits = jnp.dot(h2.astype(bf), w3_ref[...], preferred_element_type=jnp.float32)
    o_ref[...] = jax.nn.sigmoid(logits + b3_ref[...]).astype(o_ref.dtype)


# ------------------------- One-time parameter prep ------------------------- #
def prepare_classifier_params(w_fe, w1, b1, w2, b2, w3, b3):
    """Pad every feature dim to a multiple of 128 lanes and cast MXU operands
    to bf16.  Weights are frozen, so this runs once at init (hoisted out of
    the per-call path).  Zero padding keeps the real output columns exact."""
    K, in_size = w_fe.shape
    hidden = w1.shape[1]
    num_classes = w3.shape[1]

    Kp = _round_up(K, 128)
    Fp = _round_up(in_size, 128)
    Hp = _round_up(hidden, 128)
    Cp = _round_up(num_classes, 128)

    bf = jnp.bfloat16
    wfe_p = jnp.zeros((Kp, Fp), bf).at[:K, :in_size].set(w_fe.astype(bf))
    w1_p = jnp.zeros((Fp, Hp), bf).at[:in_size, :hidden].set(w1.astype(bf))
    b1_p = jnp.zeros((1, Hp), jnp.float32).at[:, :hidden].set(b1.reshape(1, -1))
    w2_p = jnp.zeros((Hp, Fp), bf).at[:hidden, :in_size].set(w2.astype(bf))
    b2_p = jnp.zeros((1, Fp), jnp.float32).at[:, :in_size].set(b2.reshape(1, -1))
    w3_p = jnp.zeros((Fp, Cp), bf).at[:in_size, :num_classes].set(w3.astype(bf))
    b3_p = jnp.zeros((1, Cp), jnp.float32).at[:, :num_classes].set(b3.reshape(1, -1))
    return (wfe_p, w1_p, b1_p, w2_p, b2_p, w3_p, b3_p)


# ------------------------------- Wrapper ----------------------------------- #
@partial(jax.jit, static_argnames=("num_classes", "block_b"))
def classifier_forward(x, params, *, num_classes, block_b=1024):
    """Fused feature-projection -> fc1 -> relu -> fc2 -> relu -> fc3 -> sigmoid."""
    wfe_p, w1_p, b1_p, w2_p, b2_p, w3_p, b3_p = params
    B = x.shape[0]
    K = math.prod(x.shape[1:])
    Kp = wfe_p.shape[0]
    Fp, Hp = w1_p.shape
    Cp = w3_p.shape[1]

    x_flat = x.reshape(B, K)
    if Kp != K:
        # Rare path: K not a multiple of 128 (the driver's K=1024 skips this).
        x_flat = jnp.pad(x_flat, ((0, 0), (0, Kp - K)))

    # Batch tile: large to amortize per-step grid overhead, multiple of 16
    # (bf16 output sublane tile), >= 2 grid steps when the batch allows it
    # (v7x megacore), capped at block_b to respect v7x's 32 MiB scoped VMEM.
    Bp = _round_up(B, 16)
    n_steps = pl.cdiv(Bp, block_b)
    if n_steps == 1 and Bp >= 32:
        n_steps = 2
    tb = min(_round_up(pl.cdiv(Bp, n_steps), 16), block_b)
    grid = (pl.cdiv(B, tb),)   # ragged last block: garbage rows read, store masked

    # Constant index_maps: weight/bias blocks are not re-fetched per batch tile.
    def const(shape):
        return pl.BlockSpec(shape, lambda i: (0,) * len(shape))

    out_padded = pl.pallas_call(
        classifier_kernel,
        out_shape=jax.ShapeDtypeStruct((B, Cp), jnp.bfloat16),
        grid=grid,
        in_specs=[
            pl.BlockSpec((tb, Kp), lambda i: (i, 0)),   # x tiles over batch (f32)
            const((Kp, Fp)),                            # w_fe (fused projection)
            const((Fp, Hp)), const((1, Hp)),            # fc1
            const((Hp, Fp)), const((1, Fp)),            # fc2
            const((Fp, Cp)), const((1, Cp)),            # fc3
        ],
        out_specs=pl.BlockSpec((tb, Cp), lambda i: (i, 0)),
        compiler_params=pltpu.CompilerParams(
            dimension_semantics=("parallel",),          # megacore on v7x
        ),
    )(x_flat, wfe_p, w1_p, b1_p, w2_p, b2_p, w3_p, b3_p)

    return out_padded[:, :num_classes].astype(jnp.float32)


# ------------------------------ JAX references ------------------------------ #
def classifier_ref(x, w_fe, w1, b1, w2, b2, w3, b3):
    """Mirrors the kernel numerics: bf16 MXU operands, f32 accum/elementwise."""
    bf = jnp.bfloat16
    xf = x.reshape(x.shape[0], -1)
    feats = jnp.dot(xf.astype(bf), w_fe.astype(bf),
                    preferred_element_type=jnp.float32)
    h1 = jnp.maximum(
        jnp.dot(feats.astype(bf), w1.astype(bf),
                preferred_element_type=jnp.float32) + b1.reshape(1, -1), 0.0)
    h2 = jnp.maximum(
        jnp.dot(h1.astype(bf), w2.astype(bf),
                preferred_element_type=jnp.float32) + b2.reshape(1, -1), 0.0)
    logits = jnp.dot(h2.astype(bf), w3.astype(bf),
                     preferred_element_type=jnp.float32) + b3.reshape(1, -1)
    return jax.nn.sigmoid(logits)


def classifier_ref_f32(x, w_fe, w1, b1, w2, b2, w3, b3):
    """Pure f32 reference matching the PyTorch module (fidelity check)."""
    xf = x.reshape(x.shape[0], -1)
    feats = xf @ w_fe
    h1 = jnp.maximum(feats @ w1 + b1.reshape(1, -1), 0.0)
    h2 = jnp.maximum(h1 @ w2 + b2.reshape(1, -1), 0.0)
    return jax.nn.sigmoid(h2 @ w3 + b3.reshape(1, -1))


# --------------------------------- Driver ---------------------------------- #
if __name__ == "__main__":
    # cfg
    input_size = 32
    hidden_layer_ratio = 2
    hidden = input_size * hidden_layer_ratio   # 64
    num_classes = 4

    # image input, NCHW (PyTorch convention)
    B, C, H, W = 2, 4, 16, 16

    key = jax.random.PRNGKey(0)
    k_x, k_fe, k1, kb1, k2, kb2, k3, kb3 = jax.random.split(key, 8)

    x = jax.random.normal(k_x, (B, C, H, W), dtype=jnp.float32)

    # TODO(synk): the real face_feature_extractor is an arbitrary frozen
    # backbone passed into __init__; stand-in = flatten + fixed linear
    # projection to `input_size` features (its matmul is fused into the kernel).
    w_fe = jax.random.normal(k_fe, (C * H * W, input_size), dtype=jnp.float32) * 0.02

    # Classifier head parameters (stored as (in, out); PyTorch keeps (out, in))
    w1 = jax.random.normal(k1, (input_size, hidden), dtype=jnp.float32) * 0.1
    b1 = jax.random.normal(kb1, (hidden,), dtype=jnp.float32) * 0.1
    w2 = jax.random.normal(k2, (hidden, input_size), dtype=jnp.float32) * 0.1
    b2 = jax.random.normal(kb2, (input_size,), dtype=jnp.float32) * 0.1
    w3 = jax.random.normal(k3, (input_size, num_classes), dtype=jnp.float32) * 0.1
    b3 = jax.random.normal(kb3, (num_classes,), dtype=jnp.float32) * 0.1

    # One-time init: pad/cast frozen weights (hoisted out of the call path).
    params = jax.tree_util.tree_map(
        jax.block_until_ready, prepare_classifier_params(w_fe, w1, b1, w2, b2, w3, b3))

    out = jax.block_until_ready(
        classifier_forward(x, params, num_classes=num_classes))

    assert out.shape == (B, num_classes), out.shape

    # Tight check vs a reference mirroring the kernel's bf16-MXU numerics
    # (tolerance accounts for the bf16 output store: <= ~2^-9 on [0,1]).
    ref_bf = classifier_ref(x, w_fe, w1, b1, w2, b2, w3, b3)
    err_bf = float(jnp.max(jnp.abs(out - ref_bf)))
    assert err_bf < 5e-3, f"bf16-ref max abs err {err_bf}"

    # Fidelity check vs the pure-f32 PyTorch-style reference (looser tolerance
    # for bf16 MXU operands through three matmuls).
    ref_f32 = classifier_ref_f32(x, w_fe, w1, b1, w2, b2, w3, b3)
    err_f32 = float(jnp.max(jnp.abs(out - ref_f32)))
    assert err_f32 < 5e-2, f"f32-ref max abs err {err_f32}"

    print("KERNEL_OK")
</pallas_src>

<mosaic_0001>
module attributes {stable_mosaic.version = 11 : i64} {
  func.func @classifier_kernel(%arg0: i32, %arg1: memref<16x1024xf32, #tpu.memory_space<vmem>>, %arg2: memref<1024x128xbf16, #tpu.memory_space<vmem>>, %arg3: memref<128x128xbf16, #tpu.memory_space<vmem>>, %arg4: memref<1x128xf32, #tpu.memory_space<vmem>>, %arg5: memref<128x128xbf16, #tpu.memory_space<vmem>>, %arg6: memref<1x128xf32, #tpu.memory_space<vmem>>, %arg7: memref<128x128xbf16, #tpu.memory_space<vmem>>, %arg8: memref<1x128xf32, #tpu.memory_space<vmem>>, %arg9: memref<16x128xbf16, #tpu.memory_space<vmem>>) attributes {dimension_semantics = [#tpu.dimension_semantics<parallel>], iteration_bounds = array<i64: 1>, scalar_prefetch = 0 : i64, scratch_operands = 0 : i64, tpu.core_type = #tpu.core_type<tc>, window_params = [{transform_indices = @transform_0, window_bounds = array<i64: 16, 1024>}, {pipeline_mode = #tpu.pipeline_mode<synchronous>, transform_indices = @transform_1, window_bounds = array<i64: 1024, 128>}, {pipeline_mode = #tpu.pipeline_mode<synchronous>, transform_indices = @transform_2, window_bounds = array<i64: 128, 128>}, {pipeline_mode = #tpu.pipeline_mode<synchronous>, transform_indices = @transform_3, window_bounds = array<i64: 1, 128>}, {pipeline_mode = #tpu.pipeline_mode<synchronous>, transform_indices = @transform_4, window_bounds = array<i64: 128, 128>}, {pipeline_mode = #tpu.pipeline_mode<synchronous>, transform_indices = @transform_5, window_bounds = array<i64: 1, 128>}, {pipeline_mode = #tpu.pipeline_mode<synchronous>, transform_indices = @transform_6, window_bounds = array<i64: 128, 128>}, {pipeline_mode = #tpu.pipeline_mode<synchronous>, transform_indices = @transform_7, window_bounds = array<i64: 1, 128>}, {transform_indices = @transform_8, window_bounds = array<i64: 16, 128>}]} {
    %c0 = arith.constant 0 : index
    %c0_0 = arith.constant 0 : index
    %0 = vector.load %arg1[%c0, %c0_0] : memref<16x1024xf32, #tpu.memory_space<vmem>>, vector<16x1024xf32>
    %1 = arith.truncf %0 : vector<16x1024xf32> to vector<16x1024xbf16>
    %c0_1 = arith.constant 0 : index
    %c0_2 = arith.constant 0 : index
    %2 = vector.load %arg2[%c0_1, %c0_2] : memref<1024x128xbf16, #tpu.memory_space<vmem>>, vector<1024x128xbf16>
    %cst = arith.constant dense<0.000000e+00> : vector<16x128xf32>
    %3 = tpu.matmul %1, %2, %cst {dimension_numbers = #tpu.dot_dimension_numbers<[1], [0], [0], [1], [0, 0, 1, 1], [], []>} : vector<16x1024xbf16>, vector<1024x128xbf16>, vector<16x128xf32> -> vector<16x128xf32>
    %4 = arith.truncf %3 : vector<16x128xf32> to vector<16x128xbf16>
    %c0_3 = arith.constant 0 : index
    %c0_4 = arith.constant 0 : index
    %5 = vector.load %arg3[%c0_3, %c0_4] : memref<128x128xbf16, #tpu.memory_space<vmem>>, vector<128x128xbf16>
    %cst_5 = arith.constant dense<0.000000e+00> : vector<16x128xf32>
    %6 = tpu.matmul %4, %5, %cst_5 {dimension_numbers = #tpu.dot_dimension_numbers<[1], [0], [0], [1], [0, 0, 1, 1], [], []>} : vector<16x128xbf16>, vector<128x128xbf16>, vector<16x128xf32> -> vector<16x128xf32>
    %c0_6 = arith.constant 0 : index
    %c0_7 = arith.constant 0 : index
    %7 = vector.load %arg4[%c0_6, %c0_7] : memref<1x128xf32, #tpu.memory_space<vmem>>, vector<1x128xf32>
    %8 = vector.broadcast %7 : vector<1x128xf32> to vector<16x128xf32>
    %9 = arith.addf %6, %8 : vector<16x128xf32>
    %cst_8 = arith.constant 0.000000e+00 : f32
    %10 = vector.broadcast %cst_8 : f32 to vector<16x128xf32>
    %11 = arith.maximumf %9, %10 : vector<16x128xf32>
    %12 = arith.truncf %11 : vector<16x128xf32> to vector<16x128xbf16>
    %c0_9 = arith.constant 0 : index
    %c0_10 = arith.constant 0 : index
    %13 = vector.load %arg5[%c0_9, %c0_10] : memref<128x128xbf16, #tpu.memory_space<vmem>>, vector<128x128xbf16>
    %cst_11 = arith.constant dense<0.000000e+00> : vector<16x128xf32>
    %14 = tpu.matmul %12, %13, %cst_11 {dimension_numbers = #tpu.dot_dimension_numbers<[1], [0], [0], [1], [0, 0, 1, 1], [], []>} : vector<16x128xbf16>, vector<128x128xbf16>, vector<16x128xf32> -> vector<16x128xf32>
    %c0_12 = arith.constant 0 : index
    %c0_13 = arith.constant 0 : index
    %15 = vector.load %arg6[%c0_12, %c0_13] : memref<1x128xf32, #tpu.memory_space<vmem>>, vector<1x128xf32>
    %16 = vector.broadcast %15 : vector<1x128xf32> to vector<16x128xf32>
    %17 = arith.addf %14, %16 : vector<16x128xf32>
    %cst_14 = arith.constant 0.000000e+00 : f32
    %18 = vector.broadcast %cst_14 : f32 to vector<16x128xf32>
    %19 = arith.maximumf %17, %18 : vector<16x128xf32>
    %20 = arith.truncf %19 : vector<16x128xf32> to vector<16x128xbf16>
    %c0_15 = arith.constant 0 : index
    %c0_16 = arith.constant 0 : index
    %21 = vector.load %arg7[%c0_15, %c0_16] : memref<128x128xbf16, #tpu.memory_space<vmem>>, vector<128x128xbf16>
    %cst_17 = arith.constant dense<0.000000e+00> : vector<16x128xf32>
    %22 = tpu.matmul %20, %21, %cst_17 {dimension_numbers = #tpu.dot_dimension_numbers<[1], [0], [0], [1], [0, 0, 1, 1], [], []>} : vector<16x128xbf16>, vector<128x128xbf16>, vector<16x128xf32> -> vector<16x128xf32>
    %c0_18 = arith.constant 0 : index
    %c0_19 = arith.constant 0 : index
    %23 = vector.load %arg8[%c0_18, %c0_19] : memref<1x128xf32, #tpu.memory_space<vmem>>, vector<1x128xf32>
    %24 = vector.broadcast %23 : vector<1x128xf32> to vector<16x128xf32>
    %25 = arith.addf %22, %24 : vector<16x128xf32>
    %26 = arith.negf %25 : vector<16x128xf32>
    %27 = math.exp %26 : vector<16x128xf32>
    %cst_20 = arith.constant 1.000000e+00 : f32
    %28 = vector.broadcast %cst_20 : f32 to vector<16x128xf32>
    %29 = arith.addf %28, %27 : vector<16x128xf32>
    %30 = arith.divf %28, %29 : vector<16x128xf32>
    %31 = arith.truncf %30 : vector<16x128xf32> to vector<16x128xbf16>
    %c0_21 = arith.constant 0 : index
    %c0_22 = arith.constant 0 : index
    %32 = vector.load %arg9[%c0_21, %c0_22] : memref<16x128xbf16, #tpu.memory_space<vmem>>, vector<16x128xbf16>
    tpu.vector_store %arg9[%c0_21, %c0_22], %31 {strides = array<i32>} : memref<16x128xbf16, #tpu.memory_space<vmem>>, vector<16x128xbf16>,
    return
  }
  func.func @transform_0(%arg0: i32) -> (i32, i32) {
    %c0_i32 = arith.constant 0 : i32
    %c0_i32_0 = arith.constant 0 : i32
    return %arg0, %c0_i32 : i32, i32
  }
  func.func @transform_1(%arg0: i32) -> (i32, i32) {
    %c0_i32 = arith.constant 0 : i32
    %c0_i32_0 = arith.constant 0 : i32
    %c0_i32_1 = arith.constant 0 : i32
    return %c0_i32, %c0_i32_0 : i32, i32
  }
  func.func @transform_2(%arg0: i32) -> (i32, i32) {
    %c0_i32 = arith.constant 0 : i32
    %c0_i32_0 = arith.constant 0 : i32
    %c0_i32_1 = arith.constant 0 : i32
    return %c0_i32, %c0_i32_0 : i32, i32
  }
  func.func @transform_3(%arg0: i32) -> (i32, i32) {
    %c0_i32 = arith.constant 0 : i32
    %c0_i32_0 = arith.constant 0 : i32
    %c0_i32_1 = arith.constant 0 : i32
    return %c0_i32, %c0_i32_0 : i32, i32
  }
  func.func @transform_4(%arg0: i32) -> (i32, i32) {
    %c0_i32 = arith.constant 0 : i32
    %c0_i32_0 = arith.constant 0 : i32
    %c0_i32_1 = arith.constant 0 : i32
    return %c0_i32, %c0_i32_0 : i32, i32
  }
  func.func @transform_5(%arg0: i32) -> (i32, i32) {
    %c0_i32 = arith.constant 0 : i32
    %c0_i32_0 = arith.constant 0 : i32
    %c0_i32_1 = arith.constant 0 : i32
    return %c0_i32, %c0_i32_0 : i32, i32
  }
  func.func @transform_6(%arg0: i32) -> (i32, i32) {
    %c0_i32 = arith.constant 0 : i32
    %c0_i32_0 = arith.constant 0 : i32
    %c0_i32_1 = arith.constant 0 : i32
    return %c0_i32, %c0_i32_0 : i32, i32
  }
  func.func @transform_7(%arg0: i32) -> (i32, i32) {
    %c0_i32 = arith.constant 0 : i32
    %c0_i32_0 = arith.constant 0 : i32
    %c0_i32_1 = arith.constant 0 : i32
    return %c0_i32, %c0_i32_0 : i32, i32
  }
  func.func @transform_8(%arg0: i32) -> (i32, i32) {
    %c0_i32 = arith.constant 0 : i32
    %c0_i32_0 = arith.constant 0 : i32
    return %arg0, %c0_i32 : i32, i32
  }
}

</mosaic_0001>

<bundles_post_ra>
// kernel: classifier_forward.1
= control target key start
LH: loop header
LB: loop body
LE: loop exit
PB: predicated region body
PF: predicated region fallthrough
CT: control target
= control target key end

     0   :  { %13 = vsyncpa [#allocation3], 0  ;;  %s2063_s0 = inlined_call_operand.vmem [shape: f32[2,1024], index: 0, kind: input, shape index: {}]   ;;  %s2064_s1 = inlined_call_operand.hbm [shape: bf16[1024,128], index: 1, kind: input, shape index: {}]   ;;  %s2065_s2 = inlined_call_operand.vmem [shape: bf16[128,128], index: 2, kind: input, shape index: {}]   ;;  %s2066_s3 = inlined_call_operand.vmem [shape: f32[1,128], index: 3, kind: input, shape index: {}]   ;;  %s2067_s4 = inlined_call_operand.vmem [shape: bf16[128,128], index: 4, kind: input, shape index: {}]   ;;  %s2068_s5 = inlined_call_operand.vmem [shape: f32[1,128], index: 5, kind: input, shape index: {}]   ;;  %s2069_s6 = inlined_call_operand.hbm [shape: bf16[128,128], index: 6, kind: input, shape index: {}]   ;;  %s2070_s7 = inlined_call_operand.vmem [shape: f32[1,128], index: 7, kind: input, shape index: {}]   ;;  %s2071_s8 = inlined_call_operand.vmem [shape: bf16[2,128], index: 8, kind: output, shape index: {}]  }
   0x1   :  { %14 = vsyncpa [#allocation5], 0  ;;  %s1844_s27 = smov [#allocation2]  }
   0x2   :  { %s22_s28 = sshll.u32 %s1844_s27, 4  ;;  %s23_s28 = int_to_ptr.vmem [resolvable:$true] %s22_s28 }
   0x3   :  { %s1808_s29 = scalar_lea.vmem %s23_s28, 8192  ;;  %p1813_p1 = scmp.lt.s32.totalorder %s23_s28, %s23_s28 }
   0x4   :  { %p1809_p0 = scmp.ne.s32.totalorder %s23_s28, %s1808_s29  ;;  %p1814_p2 = scmp.lt.s32.totalorder %s1808_s29, %s1808_s29 }
   0x6   :  { %p1815_p3 = por %p1814_p2, %p1813_p1 }
   0x8   :  { %p1816_p4 = pnand %p1815_p3, %p1809_p0 }
   0xa   :  { %1819 = shalt.err (!%p1816_p4)
}
   0xb   :  { %s1845_s30 = smov 64   ;;  %s1846_s9 = smov 4  }
   0xc   :  { %28 = dma.hbm_to_vmem [thread:$0]  %s2064_s1, 8192, %s23_s28, [#allocation3], %s1845_s30, %s1845_s30, %s1846_s9  }
   0xd   :  { %s1847_s12 = smov [#allocation4]  }
   0xe   :  { %s42_s13 = sshll.u32 %s1847_s12, 4  ;;  %s43_s13 = int_to_ptr.vmem [resolvable:$true] %s42_s13 }
   0xf   :  { %s1828_s14 = scalar_lea.vmem %s43_s13, 1024  ;;  %p1833_p6 = scmp.lt.s32.totalorder %s43_s13, %s43_s13 }
  0x10   :  { %p1829_p5 = scmp.ne.s32.totalorder %s43_s13, %s1828_s14  ;;  %p1834_p7 = scmp.lt.s32.totalorder %s1828_s14, %s1828_s14 }
  0x12   :  { %p1835_p8 = por %p1834_p7, %p1833_p6 }
  0x14   :  { %p1836_p9 = pnand %p1835_p8, %p1829_p5 }
  0x16   :  { %1839 = shalt.err (!%p1836_p9)
}
  0x17   :  { %48 = dma.hbm_to_vmem [thread:$0]  %s2069_s6, 1024, %s43_s13, [#allocation5], %s1845_s30, %s1845_s30, %s1846_s9  }
  0x18   :  { %1840 = dma.done.wait [#allocation3], 8192  }
  0x19   :  { %1841 = vsyncadd [#allocation3], 4294959104 }
  0x1a   :  { %1842 = dma.done.wait [#allocation5], 1024  }
  0x1b   :  { %1843 = vsyncadd [#allocation5], 4294966272  ;;  %v1680_v0 = vld [vmem:[#allocation2 + $0x78] sm:$0xff]   ;;  %v1684_v4 = vld [vmem:[#allocation2 + $0x70] sm:$0xff]   ;;  %v1848_v25 = vmov 1983009808   ;;  %v97_v27 = vlaneseq }
  0x1c   :  { %v1681_v1 = vld [vmem:[#allocation2 + $0xf8] sm:$0xff]   ;;  %1497 = vmatprep.subr.bf16.mxu0 %v1680_v0  ;;  %v1685_v5 = vld [vmem:[#allocation2 + $0xf0] sm:$0xff]   ;;  %v1688_v8 = vld [vmem:[#allocation2 + $0x68] sm:$0xff]   ;;  %v95_v26 = vunpack.c.l.s4 %v1848_v25  ;;  %vm1850_vm0 = vmmov 0  }
  0x1d   :  { %v1682_v2 = vld [vmem:[#allocation2 + $0x38] sm:$0xff]   ;;  %1519 = vmatprep.subr.bf16.mxu1 %v1681_v1  ;;  %v1686_v6 = vld [vmem:[#allocation2 + $0x30] sm:$0xff]   ;;  %v1689_v9 = vld [vmem:[#allocation2 + $0xe8] sm:$0xff]   ;;  %v1903_v33 = vshrl.u32 %v97_v27, 7 }
  0x1e   :  { %v1683_v3 = vld [vmem:[#allocation2 + $0xb8] sm:$0xff]   ;;  %1498 = vmatpush3.bf16.msra.mxu0 %v1682_v2  ;;  %v1687_v7 = vld [vmem:[#allocation2 + $0xb0] sm:$0xff]   ;;  %v1690_v10 = vld [vmem:[#allocation2 + $0x28] sm:$0xff]   ;;  %v96_v32 = vunpack.c.0.s8 %v95_v26 }
  0x1f   :  { %1520 = vmatpush3.bf16.msra.mxu1 %v1683_v3  ;;  %1499 = vmatprep.subr.bf16.mxu0 %v1684_v4  ;;  %v1691_v11 = vld [vmem:[#allocation2 + $0xa8] sm:$0xff]   ;;  %v1692_v12 = vld [vmem:[#allocation2 + $0x60] sm:$0xff]   ;;  %v1696_v16 = vld [vmem:[#allocation2 + $0x58] sm:$0xff]  }
  0x20   :  { %1521 = vmatprep.subr.bf16.mxu1 %v1685_v5  ;;  %v1693_v13 = vld [vmem:[#allocation2 + $0xe0] sm:$0xff]   ;;  %v1697_v17 = vld [vmem:[#allocation2 + $0xd8] sm:$0xff]   ;;  %v1700_v20 = vld [vmem:[#allocation2 + $0x50] sm:$0xff]   ;;  %v1906_v37 = vsub.s32 %v96_v32, %v1903_v33 }
  0x21   :  { %v1694_v14 = vld [vmem:[#allocation2 + $0x20] sm:$0xff]   ;;  %v1698_v18 = vld [vmem:[#allocation2 + $0x18] sm:$0xff]   ;;  %v1701_v21 = vld [vmem:[#allocation2 + $0xd0] sm:$0xff]  }
  0x22   :  { %1500 = vmatpush3.bf16.msra.mxu0 %v1686_v6  ;;  %v1695_v15 = vld [vmem:[#allocation2 + $0xa0] sm:$0xff]   ;;  %v1699_v19 = vld [vmem:[#allocation2 + $0x98] sm:$0xff]   ;;  %v1702_v22 = vld [vmem:[#allocation2 + $0x10] sm:$0xff]  }
  0x23   :  { %1522 = vmatpush3.bf16.msra.mxu1 %v1687_v7  ;;  %1501 = vmatprep.subr.bf16.mxu0 %v1688_v8  ;;  %v1703_v23 = vld [vmem:[#allocation2 + $0x90] sm:$0xff]   ;;  %v1704_v24 = vld [vmem:[#allocation2 + $0x48] sm:$0xff]   ;;  %v1708_v31 = vld [vmem:[#allocation2 + $0x40] sm:$0xff]  }
  0x24   :  { %1523 = vmatprep.subr.bf16.mxu1 %v1689_v9  ;;  %v1705_v28 = vld [vmem:[#allocation2 + $0xc8] sm:$0xff]   ;;  %v1709_v34 = vld [vmem:[#allocation2 + $0xc0] sm:$0xff]   ;;  %v1724_v53 = vld [vmem:[#allocation2 + $0x178] sm:$0xff]  }
  0x25   :  { %v1706_v29 = vld [vmem:[#allocation2 + $0x8] sm:$0xff]   ;;  %v1710_v35 = vld [vmem:[#allocation2] sm:$0xff]   ;;  %v1725_v58 = vld [vmem:[#allocation2 + $0x1f8] sm:$0xff]  }
  0x26   :  { %1502 = vmatpush3.bf16.msra.mxu0 %v1690_v10  ;;  %v1707_v30 = vld [vmem:[#allocation2 + $0x88] sm:$0xff]   ;;  %v1711_v36 = vld [vmem:[#allocation2 + $0x80] sm:$0xff]   ;;  %v1726_v62 = vld [vmem:[#allocation2 + $0x138] sm:$0xff]  }
  0x27   :  { %1524 = vmatpush3.bf16.msra.mxu1 %v1691_v11  ;;  %1503 = vmatprep.subr.bf16.mxu0 %v1692_v12  ;;  %v1712_v38 = vld [vmem:[%s2063_s0] ss:$16 sps:$4 sm:$0xff]   ;;  %v1720_v43 = vld [vmem:[%s2063_s0 + $0x4] ss:$16 sps:$4 sm:$0xff]   ;;  %v1727_v2 = vld [vmem:[#allocation2 + $0x1b8] sm:$0xff]  }
  0x28   :  { %1525 = vmatprep.subr.bf16.mxu1 %v1693_v13  ;;  %v1714_v39 = vld [vmem:[%s2063_s0 + $0x20] ss:$16 sps:$4 sm:$0xff]   ;;  %v100_v42 = vrot.slane %v1712_v38, %v1906_v37  ;;  %v1721_v44 = vld [vmem:[%s2063_s0 + $0x24] ss:$16 sps:$4 sm:$0xff]   ;;  %v107_v50 = vrot.slane %v1720_v43, %v1906_v37  ;;  %v1732_v10 = vld [vmem:[#allocation2 + $0x168] sm:$0xff]  }
  0x29   :  { %v1716_v40 = vld [vmem:[%s2063_s0 + $0x40] ss:$16 sps:$4 sm:$0xff]   ;;  %v1722_v45 = vld [vmem:[%s2063_s0 + $0x44] ss:$16 sps:$4 sm:$0xff]   ;;  %v114_v46 = vrot.slane %v1714_v39, %v1906_v37  ;;  %v121_v51 = vrot.slane %v1721_v44, %v1906_v37  ;;  %v1733_v11 = vld [vmem:[#allocation2 + $0x1e8] sm:$0xff]  }
  0x2a   :  { %1504 = vmatpush3.bf16.msra.mxu0 %v1694_v14  ;;  %v1718_v41 = vld [vmem:[%s2063_s0 + $0x60] ss:$16 sps:$4 sm:$0xff]   ;;  %v172_v47 = vrot.slane %v1716_v40, %v1906_v37  ;;  %v1723_v49 = vld [vmem:[%s2063_s0 + $0x64] ss:$16 sps:$4 sm:$0xff]   ;;  %v179_v52 = vrot.slane %v1722_v45, %v1906_v37  ;;  %v1734_v12 = vld [vmem:[#allocation2 + $0x128] sm:$0xff]  }
  0x2b   :  { %1526 = vmatpush3.bf16.msra.mxu1 %v1695_v15  ;;  %1505 = vmatprep.subr.bf16.mxu0 %v1696_v16  ;;  %v186_v48 = vrot.slane %v1718_v41, %v1906_v37  ;;  %v123_v54 = vcombine.high %v100_v42, %v114_v46  ;;  %v193_v56 = vrot.slane %v1723_v49, %v1906_v37  ;;  %v1728_v4 = vld [vmem:[#allocation2 + $0x170] sm:$0xff]   ;;  %v1735_v13 = vld [vmem:[#allocation2 + $0x1a8] sm:$0xff]   ;;  %v1736_v14 = vld [vmem:[#allocation2 + $0x160] sm:$0xff]  }
  0x2c   :  { %1527 = vmatprep.subr.bf16.mxu1 %v1697_v17  ;;  %v122_v57 = vcombine.low %v100_v42, %v114_v46  ;;  %v125_v59 = vcombine.high %v107_v50, %v121_v51  ;;  %v124_v61 = vcombine.low %v107_v50, %v121_v51  ;;  %v1729_v7 = vld [vmem:[#allocation2 + $0x1f0] sm:$0xff]   ;;  %v1737_v15 = vld [vmem:[#allocation2 + $0x1e0] sm:$0xff]   ;;  %v1748_v26 = vld [vmem:[#allocation2 + $0x148] sm:$0xff]  }
  0x2d   :  { %v195_v55 = vcombine.high %v172_v47, %v186_v48  ;;  %v194_v60 = vcombine.low %v172_v47, %v186_v48  ;;  %v197_v0 = vcombine.high %v179_v52, %v193_v56  ;;  %v196_v1 = vcombine.low %v179_v52, %v193_v56  ;;  %v1730_v8 = vld [vmem:[#allocation2 + $0x130] sm:$0xff]   ;;  %v1738_v16 = vld [vmem:[#allocation2 + $0x120] sm:$0xff]   ;;  %v1749_v27 = vld [vmem:[#allocation2 + $0x1c8] sm:$0xff]  }
  0x2e   :  { %1506 = vmatpush3.bf16.msra.mxu0 %v1698_v18  ;;  %v1731_v9 = vld [vmem:[#allocation2 + $0x1b0] sm:$0xff]   ;;  %v1739_v17 = vld [vmem:[#allocation2 + $0x1a0] sm:$0xff]   ;;  %v1740_v18 = vld [vmem:[#allocation2 + $0x158] sm:$0xff]  }
  0x2f   :  { %1528 = vmatpush3.bf16.msra.mxu1 %v1699_v19  ;;  %1507 = vmatprep.subr.bf16.mxu0 %v1700_v20  ;;  %v251_v63 = vpack.c.bf16 %v195_v55, %v123_v54  ;;  %v250_v3 = vpack.c.bf16 %v194_v60, %v122_v57  ;;  %v253_v5 = vpack.c.bf16 %v197_v0, %v125_v59  ;;  %v1741_v19 = vld [vmem:[#allocation2 + $0x1d8] sm:$0xff]   ;;  %v1747_v25 = vld [vmem:[#allocation2 + $0x190] sm:$0xff]   ;;  %v1754_v32 = vld [vmem:[#allocation2 + $0x100] sm:$0xff]  }
  0x30   :  { %1529 = vmatprep.subr.bf16.mxu1 %v1701_v21  ;;  %v252_v6 = vpack.c.bf16 %v196_v1, %v124_v61  ;;  %v1742_v20 = vld [vmem:[#allocation2 + $0x118] sm:$0xff]   ;;  %v1769_v1 = vld [vmem:[%s2065_s2 + $0x30] sm:$0xff]  }
  0x31   :  { %802 = vmatprep.mubr.bf16.mxu0 %v251_v63  ;;  %843 = vmatprep.mubr.bf16.mxu1 %v253_v5  ;;  %v1743_v21 = vld [vmem:[#allocation2 + $0x198] sm:$0xff]   ;;  %v1773_v5 = vld [vmem:[%s2065_s2 + $0x10] sm:$0xff]  }
  0x32   :  { %1508 = vmatpush3.bf16.msra.mxu0 %v1702_v22  ;;  %v1744_v22 = vld [vmem:[#allocation2 + $0x150] sm:$0xff]   ;;  %v1760_v38 = vld [vmem:[%s2063_s0 + $0x48] ss:$16 sps:$4 sm:$0xff]   ;;  %v1764_v40 = vld [vmem:[%s2063_s0 + $0xc] ss:$16 sps:$4 sm:$0xff]  }
  0x33   :  { %1530 = vmatpush3.bf16.msra.mxu1 %v1703_v23  ;;  %1509 = vmatprep.subr.bf16.mxu0 %v1704_v24  ;;  %v1745_v23 = vld [vmem:[#allocation2 + $0x1d0] sm:$0xff]   ;;  %v1762_v39 = vld [vmem:[%s2063_s0 + $0x68] ss:$16 sps:$4 sm:$0xff]   ;;  %v1765_v41 = vld [vmem:[%s2063_s0 + $0x2c] ss:$16 sps:$4 sm:$0xff]   ;;  %v208_v44 = vrot.slane %v1760_v38, %v1906_v37  ;;  %v143_v48 = vrot.slane %v1764_v40, %v1906_v37 }
  0x34   :  { %1531 = vmatprep.subr.bf16.mxu1 %v1705_v28  ;;  %v1746_v24 = vld [vmem:[#allocation2 + $0x110] sm:$0xff]   ;;  %v1750_v28 = vld [vmem:[#allocation2 + $0x108] sm:$0xff]   ;;  %v222_v47 = vrot.slane %v1762_v39, %v1906_v37  ;;  %v157_v49 = vrot.slane %v1765_v41, %v1906_v37  ;;  %v1768_v0 = vld [vmem:[%s2065_s2 + $0x38] sm:$0xff]  }
  0x35   :  { %v1766_v45 = vld [vmem:[%s2063_s0 + $0x4c] ss:$16 sps:$4 sm:$0xff]  }
  0x36   :  { %1510 = vmatpush3.bf16.msra.mxu0 %v1706_v29  ;;  %v1751_v29 = vld [vmem:[#allocation2 + $0x188] sm:$0xff]   ;;  %v215_v51 = vrot.slane %v1766_v45, %v1906_v37  ;;  %v231_v54 = vcombine.high %v208_v44, %v222_v47  ;;  %v161_v55 = vcombine.high %v143_v48, %v157_v49  ;;  %v230_v56 = vcombine.low %v208_v44, %v222_v47 }
  0x37   :  { %1532 = vmatpush3.bf16.msra.mxu1 %v1707_v30  ;;  %1511 = vmatprep.subr.bf16.mxu0 %v1708_v31  ;;  %v1752_v30 = vld [vmem:[#allocation2 + $0x140] sm:$0xff]   ;;  %v1767_v46 = vld [vmem:[%s2063_s0 + $0x6c] ss:$16 sps:$4 sm:$0xff]   ;;  %v160_v57 = vcombine.low %v143_v48, %v157_v49 }
  0x38   :  { %1533 = vmatprep.subr.bf16.mxu1 %v1709_v34  ;;  %v1753_v31 = vld [vmem:[#allocation2 + $0x1c0] sm:$0xff]   ;;  %v229_v52 = vrot.slane %v1767_v46, %v1906_v37  ;;  %v1781_v46 = vld [vmem:[%s2067_s4 + $0x10] sm:$0xff]   ;;  %v1782_v47 = vld [vmem:[%s2067_s4 + $0x8] sm:$0xff]  }
  0x39   :  { %v1755_v34 = vld [vmem:[#allocation2 + $0x180] sm:$0xff]   ;;  %v1784_v49 = vld [vmem:[#allocation4 + $0x38] sm:$0xff]  }
  0x3a   :  { %1512 = vmatpush3.bf16.msra.mxu0 %v1710_v35  ;;  %v1756_v35 = vld [vmem:[%s2063_s0 + $0x8] ss:$16 sps:$4 sm:$0xff]   ;;  %v232_v59 = vcombine.low %v215_v51, %v229_v52  ;;  %v1783_v48 = vld [vmem:[%s2067_s4] sm:$0xff]  }
  0x3b   :  { %1534 = vmatpush3.bf16.msra.mxu1 %v1711_v36  ;;  %1541 = vmatprep.subr.bf16.mxu0 %v1724_v53  ;;  %v1758_v36 = vld [vmem:[%s2063_s0 + $0x28] ss:$16 sps:$4 sm:$0xff]   ;;  %v136_v42 = vrot.slane %v1756_v35, %v1906_v37 }
  0x3c   :  { %1563 = vmatprep.subr.bf16.mxu1 %v1725_v58  ;;  %v150_v43 = vrot.slane %v1758_v36, %v1906_v37  ;;  %v233_v58 = vcombine.high %v215_v51, %v229_v52  ;;  %v256_v63 = vpack.c.bf16 %v232_v59, %v160_v57  ;;  %v1849_v37 = vmov 0.0   ;;  %v1786_v51 = vld [vmem:[#allocation4 + $0x28] sm:$0xff]   ;;  %v1787_v52 = vld [vmem:[#allocation4 + $0x20] sm:$0xff]  }
  0x3d   :  { %803 = vmatmul.mubr.bf16.vlgmr.msra.gmra.mxu0 %v250_v3  ;;  %v1771_v3 = vld [vmem:[%s2065_s2 + $0x20] sm:$0xff]  }
  0x3e   :  { %1542 = vmatpush3.bf16.msra.mxu0 %v1726_v62  ;;  %844 = vmatmul.mubr.bf16.vlgmr.msra.gmra.mxu1 %v252_v6  ;;  %v159_v50 = vcombine.high %v136_v42, %v150_v43  ;;  %v158_v53 = vcombine.low %v136_v42, %v150_v43  ;;  %v257_v62 = vpack.c.bf16 %v233_v58, %v161_v55  ;;  %v1774_v6 = vld [vmem:[%s2065_s2 + $0x8] sm:$0xff]  }
  0x3f   :  { %1543 = vmatprep.subr.bf16.mxu0 %v1728_v4  ;;  %1564 = vmatpush3.bf16.msra.mxu1 %v1727_v2  ;;  %v1770_v2 = vld [vmem:[%s2065_s2 + $0x28] sm:$0xff]   ;;  %v1772_v4 = vld [vmem:[%s2065_s2 + $0x18] sm:$0xff]  }
  0x40   :  { %1565 = vmatprep.subr.bf16.mxu1 %v1729_v7  ;;  %v255_v60 = vpack.c.bf16 %v231_v54, %v159_v50  ;;  %v254_v61 = vpack.c.bf16 %v230_v56, %v158_v53  ;;  %925 = vmatprep.mubr.bf16.mxu1 %v257_v62  ;;  %v1775_v7 = vld [vmem:[%s2065_s2] sm:$0xff]   ;;  %v1785_v50 = vld [vmem:[#allocation4 + $0x30] sm:$0xff]   ;;  %v1788_v53 = vld [vmem:[#allocation4 + $0x18] sm:$0xff]  }
  0x41   :  { %v1463_v54 = vld [vmem:[%s2066_s3] ss:$0 sm:$0xff] }
  0x42   :  { %1544 = vmatpush3.bf16.msra.mxu0 %v1730_v8  ;;  %884 = vmatprep.mubr.bf16.mxu0 %v255_v60  ;;  %v1776_v8 = vld [vmem:[%s2067_s4 + $0x38] sm:$0xff]  }
  0x43   :  { %1545 = vmatprep.subr.bf16.mxu0 %v1732_v10  ;;  %1566 = vmatpush3.bf16.msra.mxu1 %v1731_v9  ;;  %v1777_v9 = vld [vmem:[%s2067_s4 + $0x30] sm:$0xff]   ;;  %v1778_v10 = vld [vmem:[%s2067_s4 + $0x28] sm:$0xff]  }
  0x44   :  { %1567 = vmatprep.subr.bf16.mxu1 %v1733_v11  ;;  %v1779_v11 = vld [vmem:[%s2067_s4 + $0x20] sm:$0xff]  }
  0x46   :  { %1546 = vmatpush3.bf16.msra.mxu0 %v1734_v12  ;;  %v1780_v12 = vld [vmem:[%s2067_s4 + $0x18] sm:$0xff]  }
  0x47   :  { %1547 = vmatprep.subr.bf16.mxu0 %v1736_v14  ;;  %1568 = vmatpush3.bf16.msra.mxu1 %v1735_v13 }
  0x48   :  { %1569 = vmatprep.subr.bf16.mxu1 %v1737_v15 }
  0x4a   :  { %1548 = vmatpush3.bf16.msra.mxu0 %v1738_v16 }
  0x4b   :  { %1549 = vmatprep.subr.bf16.mxu0 %v1740_v18  ;;  %1570 = vmatpush3.bf16.msra.mxu1 %v1739_v17 }
  0x4c   :  { %1571 = vmatprep.subr.bf16.mxu1 %v1741_v19 }
  0x4e   :  { %1550 = vmatpush3.bf16.msra.mxu0 %v1742_v20 }
  0x4f   :  { %1551 = vmatprep.subr.bf16.mxu0 %v1744_v22  ;;  %1572 = vmatpush3.bf16.msra.mxu1 %v1743_v21 }
  0x50   :  { %1573 = vmatprep.subr.bf16.mxu1 %v1745_v23 }
  0x52   :  { %1552 = vmatpush3.bf16.msra.mxu0 %v1746_v24 }
  0x53   :  { %1553 = vmatprep.subr.bf16.mxu0 %v1748_v26  ;;  %1574 = vmatpush3.bf16.msra.mxu1 %v1747_v25 }
  0x54   :  { %1575 = vmatprep.subr.bf16.mxu1 %v1749_v27 }
  0x56   :  { %1554 = vmatpush3.bf16.msra.mxu0 %v1750_v28 }
  0x57   :  { %1555 = vmatprep.subr.bf16.mxu0 %v1752_v30  ;;  %1576 = vmatpush3.bf16.msra.mxu1 %v1751_v29 }
  0x58   :  { %1577 = vmatprep.subr.bf16.mxu1 %v1753_v31 }
  0x5a   :  { %1556 = vmatpush3.bf16.msra.mxu0 %v1754_v32 }
  0x5b   :  { %1578 = vmatpush3.bf16.msra.mxu1 %v1755_v34  ;;  %1612 = vmatprep.subr.bf16.mxu0 %v1849_v37 }
  0x5c   :  { %1632 = vmatprep.subr.bf16.mxu1 %v1849_v37 }
  0x5d   :  { %885 = vmatmul.mubr.bf16.vlgmr.msra.gmra.mxu0 %v254_v61 }
  0x5e   :  { %926 = vmatmul.mubr.bf16.vlgmr.msra.gmra.mxu1 %v256_v63  ;;  %1613 = vmatpush3.bf16.msra.mxu0 %v1768_v0  ;;  %v1789_v0 = vld [vmem:[#allocation4 + $0x10] sm:$0xff]  }
  0x5f   :  { %1614 = vmatprep.subr.bf16.mxu0 %v1849_v37  ;;  %1628 = vmatprep.mubr.msk.bf16.mxu0 %vm1850_vm0, %v1849_v37 }
  0x60   :  { %1648 = vmatprep.mubr.msk.bf16.mxu1 %vm1850_vm0, %v1849_v37  ;;  %1633 = vmatpush3.bf16.msra.mxu1 %v1776_v8 }
  0x61   :  { %1634 = vmatprep.subr.bf16.mxu1 %v1849_v37 }
  0x62   :  { %1615 = vmatpush3.bf16.msra.mxu0 %v1769_v1  ;;  %v1790_v1 = vld [vmem:[#allocation4 + $0x8] sm:$0xff]  }
  0x63   :  { %1616 = vmatprep.subr.bf16.mxu0 %v1849_v37 }
  0x64   :  { %1635 = vmatpush3.bf16.msra.mxu1 %v1777_v9 }
  0x65   :  { %1636 = vmatprep.subr.bf16.mxu1 %v1849_v37 }
  0x66   :  { %1617 = vmatpush3.bf16.msra.mxu0 %v1770_v2  ;;  %v1791_v2 = vld [vmem:[#allocation4] sm:$0xff]  }
  0x67   :  { %1618 = vmatprep.subr.bf16.mxu0 %v1849_v37 }
  0x68   :  { %1637 = vmatpush3.bf16.msra.mxu1 %v1778_v10 }
  0x69   :  { %1638 = vmatprep.subr.bf16.mxu1 %v1849_v37 }
  0x6a   :  { %1619 = vmatpush3.bf16.msra.mxu0 %v1771_v3  ;;  %v1472_v3 = vld [vmem:[%s2068_s5] ss:$0 sm:$0xff] }
  0x6b   :  { %1620 = vmatprep.subr.bf16.mxu0 %v1849_v37 }
  0x6c   :  { %1639 = vmatpush3.bf16.msra.mxu1 %v1779_v11 }
  0x6d   :  { %1640 = vmatprep.subr.bf16.mxu1 %v1849_v37 }
  0x6e   :  { %1621 = vmatpush3.bf16.msra.mxu0 %v1772_v4 }
  0x6f   :  { %1622 = vmatprep.subr.bf16.mxu0 %v1849_v37 }
  0x70   :  { %1641 = vmatpush3.bf16.msra.mxu1 %v1780_v12 }
  0x71   :  { %1642 = vmatprep.subr.bf16.mxu1 %v1849_v37 }
  0x72   :  { %1623 = vmatpush3.bf16.msra.mxu0 %v1773_v5 }
  0x73   :  { %1624 = vmatprep.subr.bf16.mxu0 %v1849_v37 }
  0x74   :  { %1643 = vmatpush3.bf16.msra.mxu1 %v1781_v46 }
  0x75   :  { %1644 = vmatprep.subr.bf16.mxu1 %v1849_v37 }
  0x76   :  { %1625 = vmatpush3.bf16.msra.mxu0 %v1774_v6 }
  0x77   :  { %1626 = vmatprep.subr.bf16.mxu0 %v1849_v37 }
  0x78   :  { %1645 = vmatpush3.bf16.msra.mxu1 %v1782_v47 }
  0x79   :  { %1646 = vmatprep.subr.bf16.mxu1 %v1849_v37 }
  0x7a   :  { %1627 = vmatpush3.bf16.msra.mxu0 %v1775_v7 }
  0x7b   :  { %1652 = vmatprep.subr.bf16.mxu0 %v1849_v37 }
  0x7c   :  { %1647 = vmatpush3.bf16.msra.mxu1 %v1783_v48 }
  0xfd   :  { %v1513_v13 = vpop.f32.mrf.mxu0 }
  0xfe   :  { %v1535_v14 = vpop.f32.mrf.mxu1 }
  0xff   :  { %v1514_v15 = vpop.f32.mrf.mxu0 }
 0x100   :  { %v1536_v16 = vpop.f32.mrf.mxu1  ;;  %v1515_v22 = vadd.f32 %v1514_v15, %v1513_v13 }
 0x101   :  { %v1516_v17 = vpop.f32.mrf.mxu0  ;;  %v1537_v23 = vadd.f32 %v1536_v16, %v1535_v14 }
 0x102   :  { %v1538_v18 = vpop.f32.mrf.mxu1 }
 0x103   :  { %v1517_v19 = vpop.f32.mrf.mxu0  ;;  %v846_v31 = vadd.f32 %v1537_v23, %v1515_v22 }
 0x104   :  { %v1539_v20 = vpop.f32.mrf.mxu1  ;;  %v1518_v26 = vadd.f32 %v1517_v19, %v1516_v17 }
 0x105   :  { %v1540_v27 = vadd.f32 %v1539_v20, %v1538_v18 }
 0x107   :  { %v849_v35 = vadd.f32 %v1540_v27, %v1518_v26 }
 0x11d   :  { %v1557_v21 = vpop.f32.mrf.mxu0 }
 0x11e   :  { %v1579_v24 = vpop.f32.mrf.mxu1 }
 0x11f   :  { %v1558_v25 = vpop.f32.mrf.mxu0 }
 0x120   :  { %v1559_v28 = vadd.f32 %v1558_v25, %v1557_v21  ;;  %v1580_v29 = vpop.f32.mrf.mxu1  ;;  %v1851_v25 = vmov 1966171168  }
 0x121   :  { %v1560_v30 = vpop.f32.mrf.mxu0  ;;  %v1581_v40 = vadd.f32 %v1580_v29, %v1579_v24  ;;  %v1293_v26 = vunpack.c.l.s4 %v1851_v25 }
 0x122   :  { %v1582_v32 = vpop.f32.mrf.mxu1  ;;  %v887_v36 = vadd.f32 %v1559_v28, %v846_v31 }
 0x123   :  { %v1561_v34 = vpop.f32.mrf.mxu0  ;;  %v1294_v27 = vunpack.c.0.s8 %v1293_v26 }
 0x124   :  { %v1562_v38 = vadd.f32 %v1561_v34, %v1560_v30  ;;  %v1583_v39 = vpop.f32.mrf.mxu1  ;;  %v928_v43 = vadd.f32 %v1581_v40, %v887_v36 }
 0x125   :  { %v1584_v42 = vadd.f32 %v1583_v39, %v1582_v32  ;;  %v1297_v29 = vsub.s32 %v1294_v27, %v1903_v33 }
 0x126   :  { %v890_v41 = vadd.f32 %v1562_v38, %v849_v35 }
 0x128   :  { %v931_v44 = vadd.f32 %v1584_v42, %v890_v41 }
 0x12a   :  { %v934_v45 = vpack.c.bf16 %v931_v44, %v928_v43 }
 0x12c   :  { %1629 = vmatmul.mubr.bf16.vlgmr.msra.gmra.mxu0 %v934_v45 }
 0x12d   :  { %1668 = vmatprep.mubr.msk.bf16.mxu0 %vm1850_vm0, %v1849_v37  ;;  %1653 = vmatpush3.bf16.msra.mxu0 %v1784_v49 }
 0x12e   :  { %1654 = vmatprep.subr.bf16.mxu0 %v1849_v37 }
 0x131   :  { %1655 = vmatpush3.bf16.msra.mxu0 %v1785_v50 }
 0x132   :  { %1656 = vmatprep.subr.bf16.mxu0 %v1849_v37 }
 0x135   :  { %1657 = vmatpush3.bf16.msra.mxu0 %v1786_v51 }
 0x136   :  { %1658 = vmatprep.subr.bf16.mxu0 %v1849_v37 }
 0x139   :  { %1659 = vmatpush3.bf16.msra.mxu0 %v1787_v52 }
 0x13a   :  { %1660 = vmatprep.subr.bf16.mxu0 %v1849_v37 }
 0x13d   :  { %1661 = vmatpush3.bf16.msra.mxu0 %v1788_v53 }
 0x13e   :  { %1662 = vmatprep.subr.bf16.mxu0 %v1849_v37 }
 0x141   :  { %1663 = vmatpush3.bf16.msra.mxu0 %v1789_v0 }
 0x142   :  { %1664 = vmatprep.subr.bf16.mxu0 %v1849_v37 }
 0x145   :  { %1665 = vmatpush3.bf16.msra.mxu0 %v1790_v1 }
 0x146   :  { %1666 = vmatprep.subr.bf16.mxu0 %v1849_v37  ;;  %v1481_v37 = vld [vmem:[%s2070_s7] ss:$0 sm:$0xff] }
 0x149   :  { %1667 = vmatpush3.bf16.msra.mxu0 %v1791_v2 }
 0x1ec   :  { %v1040_v55 = vpop.f32.mrf.mxu0 }
 0x1ed   :  { %v1041_v57 = vadd.f32 %v1463_v54, %v1040_v55 }
 0x1ee   :  { %v1630_v56 = vpop.f32.mrf.mxu0 }
 0x1ef   :  { %v1047_v61 = vmax.f32 %v1041_v57, 0.0 }
 0x1f0   :  { %v1043_v58 = vpop.f32.mrf.mxu0 }
 0x1f1   :  { %v1044_v59 = vadd.f32 %v1463_v54, %v1043_v58 }
 0x1f2   :  { %v1631_v60 = vpop.f32.mrf.mxu0 }
 0x1f3   :  { %v1048_v62 = vmax.f32 %v1044_v59, 0.0 }
 0x1f5   :  { %v1049_v63 = vpack.c.bf16 %v1048_v62, %v1047_v61 }
 0x1f7   :  { %1649 = vmatmul.mubr.bf16.vlgmr.msra.gmra.mxu1 %v1049_v63 }
 0x2b7   :  { %v1155_v4 = vpop.f32.mrf.mxu1 }
 0x2b8   :  { %v1156_v6 = vadd.f32 %v1472_v3, %v1155_v4 }
 0x2b9   :  { %v1650_v5 = vpop.f32.mrf.mxu1 }
 0x2ba   :  { %v1162_v10 = vmax.f32 %v1156_v6, 0.0 }
 0x2bb   :  { %v1158_v7 = vpop.f32.mrf.mxu1 }
 0x2bc   :  { %v1159_v8 = vadd.f32 %v1472_v3, %v1158_v7 }
 0x2bd   :  { %v1651_v9 = vpop.f32.mrf.mxu1 }
 0x2be   :  { %v1163_v11 = vmax.f32 %v1159_v8, 0.0 }
 0x2c0   :  { %v1164_v12 = vpack.c.bf16 %v1163_v11, %v1162_v10 }
 0x2c2   :  { %1669 = vmatmul.mubr.bf16.vlgmr.msra.gmra.mxu0 %v1164_v12 }
 0x382   :  { %v1270_v13 = vpop.f32.mrf.mxu0 }
 0x383   :  { %v1271_v14 = vadd.f32 %v1481_v37, %v1270_v13 }
 0x384   :  { %v1670_v15 = vpop.f32.mrf.mxu0 }
 0x385   :  { %v1490_v16 = vmul.f32 -1.442695, %v1271_v14 }
 0x386   :  { %v1273_v17 = vpop.f32.mrf.mxu0 }
 0x387   :  { %1792 = vpow2.f32 %v1490_v16  ;;  %v1274_v18 = vadd.f32 %v1481_v37, %v1273_v17 }
 0x388   :  { %v1671_v19 = vpop.f32.mrf.mxu0 }
 0x389   :  { %v1491_v20 = vmul.f32 -1.442695, %v1274_v18 }
 0x38b   :  { %1794 = vpow2.f32 %v1491_v20 }
 0x394   :  { %v1793_v21 = vpop.eup %1792 }
 0x395   :  { %v1283_v22 = vadd.f32 1.0, %v1793_v21 }
 0x397   :  { %1796 = vrcp.f32 %v1283_v22 }
 0x398   :  { %v1795_v23 = vpop.eup %1794 }
 0x399   :  { %v1284_v24 = vadd.f32 1.0, %v1795_v23 }
 0x39b   :  { %1798 = vrcp.f32 %v1284_v24 }
 0x3a4   :  { %v1797_v28 = vpop.eup %1796 }
 0x3a8   :  { %v1799_v30 = vpop.eup %1798 }
 0x3a9   :  { %v1289_v31 = vpack.c.bf16 %v1799_v30, %v1797_v28 }
 0x3ab   :  { %v1298_v32 = vrot.slane %v1289_v31, %v1297_v29 }
 0x3ad   :  { %1493 = vst.sshfl [vmem:[#allocation6] sm:$0x1 pattern:$0x73625140] %v1298_v32 }
 0x3b4   :  { %v1374_v34 = vld [vmem:[#allocation6] sm:$0x1] }
 0x3b5   :  { %1375 = vst [vmem:[%s2071_s8] sm:$0x1] %v1374_v34 }
 0x3b6   :  { %1393 = vsyncpa [#allocation3], 1 }
 0x3b7   :  { %1394 = vsyncpa [#allocation5], 1 }

</bundles_post_ra>
